<compile_context>
chip_gen: v7x
topology: tpu7x:2x2x1
jax: 0.10.0
libtpu: 0.0.40
codegen_flags: <defaults>
</compile_context>

<pallas_src>
import math

import jax
import jax.numpy as jnp
import numpy as np
from jax import lax
from jax.experimental import pallas as pl
from jax.experimental.pallas import tpu as pltpu

_INV_SQRT2 = 1.0 / math.sqrt(2.0)
_LN_EPS = 1e-5


# ----------------------------- layout helpers -------------------------------
# Only needed when a real NCHW op (conv / spatial attention) is present; the
# Pallas hot path works entirely in token layout.

def token2patch(x):
    # (B, N, C) -> (B, C, H, W), H = W = sqrt(N)
    B, N, C = x.shape
    H = W = int(math.isqrt(N))
    assert H * W == N
    return jnp.transpose(x, (0, 2, 1)).reshape(B, C, H, W)


def patch2token(x):
    # (B, C, H, W) -> (B, H*W, C)
    B, C, H, W = x.shape
    return jnp.transpose(x.reshape(B, C, H * W), (0, 2, 1))


# TODO(synk): EPSABlock definition was not provided in the reference module;
# identity placeholder operating in token layout (a real implementation would
# token2patch() to NCHW, run the block, and patch2token() back).
def epsa_block_tokens(x_tok, H, W):
    return x_tok


# TODO(synk): LSA definition was not provided in the reference module;
# identity placeholder in token layout (the reference pipes its output through
# token2patch, which the identity makes a no-op here).
def lsa_block_tokens(x_tok, H, W):
    return x_tok


# ------------------ fused Pallas kernel: merge + Mlp + LN + residual --------

def _fused_kernel(a_ref, xv_ref, xi_ref,
                  w1_ref, b1_ref, w2_ref, b2_ref, g_ref, be_ref, o_ref):
    a = a_ref[...].astype(jnp.float32)     # block1(x) + block2(x), per token
    xv = xv_ref[...].astype(jnp.float32)
    xi = xi_ref[...].astype(jnp.float32)

    # branch merge: xo = (x1+x2+xv) + (x1+x2+xi) = 2*(x1+x2) + xv + xi
    xo = 2.0 * a + xv + xi

    # Mlp: fc1 -> GELU (tanh approx -> EUP) -> fc2 ; dropout p=0 is identity.
    # bf16 operands feed the MXU; accumulation stays f32.
    h = jnp.dot(xo.astype(jnp.bfloat16), w1_ref[...],
                preferred_element_type=jnp.float32) + b1_ref[...]
    h = jax.nn.gelu(h, approximate=True)
    y = jnp.dot(h.astype(jnp.bfloat16), w2_ref[...],
                preferred_element_type=jnp.float32) + b2_ref[...]

    # LayerNorm over channels (two-pass variance, matches the reference).
    mu = jnp.mean(y, axis=-1, keepdims=True)
    d = y - mu
    var = jnp.mean(d * d, axis=-1, keepdims=True)
    yn = d * lax.rsqrt(var + _LN_EPS)
    yn = yn * g_ref[...] + be_ref[...]

    # residual: xo + norm(mlp(xo))
    o_ref[...] = (xo + yn).astype(o_ref.dtype)


# ------------------------- tiling / spec helpers ----------------------------

def _vmem_capacity_bytes():
    try:
        return int(pltpu.get_tpu_info().vmem_capacity_bytes)
    except Exception:
        return 64 * 1024 * 1024       # conservative fallback (v7x per-core)


def _row_tiling(m, cap):
    """Return (row_tile, padded_rows).

    Row tile is a multiple of 8, <= `cap`, keeps >= 2 grid steps when there
    are enough rows, and never degrades to tiny tiles: if the 8-padded row
    count has no large multiple-of-8 divisor, rows are padded up to a multiple
    of a large fixed tile instead (padded rows are sliced off afterwards)."""
    m8 = -(-m // 8) * 8
    limit = min(cap, m8 if m8 < 16 else m8 // 2)
    best = 0
    for t in range(8, limit + 1, 8):
        if m8 % t == 0:
            best = t
    if best >= min(limit, max(8, cap // 2)):   # good-enough exact divisor
        return best, m8
    # fallback: fixed large tile + tile-aware padding (never tm=8)
    tm = -(-(m8 // 2) // 8) * 8 if m8 >= 16 else m8
    tm = max(8, min(cap, tm))
    return tm, -(-m8 // tm) * tm


def _const_spec(shape):
    """BlockSpec for a grid-invariant operand (constant index_map).

    Single-buffered (pl.Buffered(1)) when supported: no point double-buffering
    blocks that never change; at dim=768 this reclaims several MiB of VMEM."""
    idx = lambda i: (0, 0)
    if hasattr(pl, "Buffered"):
        try:
            return pl.BlockSpec(shape, idx, pipeline_mode=pl.Buffered(1))
        except Exception:
            pass
    return pl.BlockSpec(shape, idx)


def fused_merge_mlp_norm_residual(branch, x_v, x_i, params):
    """t = 2*branch + x_v + x_i ; returns t + LayerNorm(Mlp(t)).

    `branch` is block1(x)+block2(x) per token; all token tensors are (B,N,C);
    one pallas_call over all B*N rows."""
    B, N, C = x_v.shape
    w1, b1, w2, b2, gamma, beta = params
    Hd = w1.shape[1]

    vmem_cap = _vmem_capacity_bytes()
    row_cap = 512 if vmem_cap >= 96 * 1024 * 1024 else 256   # v5e/v6e vs v7x
    vmem_limit = int(min(96 * 1024 * 1024, (vmem_cap * 3) // 4))

    M = B * N
    tm, Mp = _row_tiling(M, row_cap)
    grid = (Mp // tm,)

    def rows(a):
        a2d = a.reshape(M, C)
        if Mp != M:
            a2d = jnp.pad(a2d, ((0, Mp - M), (0, 0)))
        return a2d

    row_spec = pl.BlockSpec((tm, C), lambda i: (i, 0))

    cost = pl.CostEstimate(
        flops=4 * Mp * C * Hd + 12 * Mp * C,              # two matmuls + elementwise
        transcendentals=Mp * Hd + Mp,                     # tanh + rsqrt
        bytes_accessed=4 * (4 * Mp * C + Hd + 3 * C) + 2 * (2 * C * Hd),
    )

    out = pl.pallas_call(
        _fused_kernel,
        out_shape=jax.ShapeDtypeStruct((Mp, C), x_v.dtype),
        grid_spec=pltpu.PrefetchScalarGridSpec(
            num_scalar_prefetch=0,
            grid=grid,
            in_specs=[
                row_spec, row_spec, row_spec,   # branch, x_v, x_i row streams
                _const_spec((C, Hd)),           # W1 (bf16, VMEM resident)
                _const_spec((1, Hd)),           # b1
                _const_spec((Hd, C)),           # W2 (bf16, VMEM resident)
                _const_spec((1, C)),            # b2
                _const_spec((1, C)),            # LN gamma
                _const_spec((1, C)),            # LN beta
            ],
            out_specs=row_spec,
        ),
        compiler_params=pltpu.CompilerParams(
            dimension_semantics=("parallel",),
            vmem_limit_bytes=vmem_limit),
        cost_estimate=cost,
    )(rows(branch), rows(x_v), rows(x_i), w1, b1, w2, b2, gamma, beta)

    return out[:M].reshape(B, N, C)


# ------------------------------- fuision forward ----------------------------

def init_params(key, dim):
    hidden = dim * 2
    k1, k2, k3, k4 = jax.random.split(key, 4)
    # nn.Linear weight is (out, in); stored here pre-transposed to (in, out).
    # fc1/fc2 weights are kept in bf16 in HBM (halves weight DMA and VMEM
    # residency; the MXU consumes bf16 natively). Biases / LN params stay f32.
    w1 = (jax.random.normal(k1, (dim, hidden), jnp.float32) * 0.02).astype(jnp.bfloat16)
    b1 = jax.random.normal(k2, (1, hidden), jnp.float32) * 0.02
    w2 = (jax.random.normal(k3, (hidden, dim), jnp.float32) * 0.02).astype(jnp.bfloat16)
    b2 = jax.random.normal(k4, (1, dim), jnp.float32) * 0.02
    gamma = jnp.ones((1, dim), jnp.float32)   # nn.LayerNorm default weight
    beta = jnp.zeros((1, dim), jnp.float32)   # nn.LayerNorm default bias
    return (w1, b1, w2, b2, gamma, beta)


def fuision_forward(params, x_v, x_i, *, lens_z):
    B, N, C = x_v.shape
    lens_x = N - lens_z
    Hx = int(math.isqrt(lens_x))
    Hz = int(math.isqrt(lens_z))

    # token split: template (z) vs. search-region (x) tokens
    z_v, xv = x_v[:, :lens_z, :], x_v[:, lens_z:, :]
    z_i, xi = x_i[:, :lens_z, :], x_i[:, lens_z:, :]

    # Branch blocks (identity placeholders, token layout -> no transposes).
    x_sum = xv + xi
    x1 = epsa_block_tokens(x_sum, Hx, Hx)
    x2 = lsa_block_tokens(x_sum, Hx, Hx)
    z_sum = z_v + z_i
    z1 = epsa_block_tokens(z_sum, Hz, Hz)
    z2 = lsa_block_tokens(z_sum, Hz, Hz)

    # The module concatenates (zo, xo) along tokens at the end, and every
    # remaining op (merge add, Mlp, LayerNorm, residual) is per-token with
    # shared weights, so both branches are re-joined *before* the kernel and a
    # single pallas_call runs over all B*N tokens. The two block outputs are
    # summed here (one cheap XLA elementwise add) so the kernel reads ONE
    # branch stream instead of two; x_v / x_i are passed unchanged (their
    # z/x slices re-concatenate to the original tensors in token order).
    branch = (jnp.concatenate((z1, x1), axis=1)
              + jnp.concatenate((z2, x2), axis=1))
    return fused_merge_mlp_norm_residual(branch, x_v, x_i, params)


# --------------------------- pure-JAX reference -----------------------------

def reference_forward(params, x_v, x_i, lens_z):
    """Transliteration of the PyTorch forward (identity EPSA/LSA), including
    the token2patch/patch2token transposes the Pallas path elides. f32 math,
    exact-erf GELU (nn.GELU default), two-pass LayerNorm."""
    w1, b1, w2, b2, g, be = params
    w1 = w1.astype(jnp.float32)
    w2 = w2.astype(jnp.float32)

    def mlp_norm(t):
        h = jnp.dot(t, w1, precision=lax.Precision.HIGHEST) + b1
        h = 0.5 * h * (1.0 + lax.erf(h * _INV_SQRT2))
        y = jnp.dot(h, w2, precision=lax.Precision.HIGHEST) + b2
        mu = jnp.mean(y, axis=-1, keepdims=True)
        var = jnp.mean((y - mu) ** 2, axis=-1, keepdims=True)
        return (y - mu) / jnp.sqrt(var + _LN_EPS) * g + be

    z_v, xv = x_v[:, :lens_z, :], x_v[:, lens_z:, :]
    z_i, xi = x_i[:, :lens_z, :], x_i[:, lens_z:, :]
    z_v, xv, z_i, xi = map(token2patch, (z_v, xv, z_i, xi))

    x = xv + xi
    x1, x2 = x, x                       # identity EPSABlock / LSA
    xo = (x1 + x2 + xv) + (x1 + x2 + xi)
    xo = patch2token(xo)
    xo = xo + mlp_norm(xo)

    z = z_v + z_i
    z1, z2 = z, z
    zo = (z1 + z2 + z_v) + (z1 + z2 + z_i)
    zo = patch2token(zo)
    zo = zo + mlp_norm(zo)

    return jnp.concatenate((zo, xo), axis=1)


# ---------------------------------- main -------------------------------------

if __name__ == "__main__":
    key = jax.random.PRNGKey(0)
    kp, kv, ki = jax.random.split(key, 3)

    B = 2
    dim = 128          # channels: multiple of 128 -> lane-dense stores
    lens_z = 16        # template tokens  -> 4x4 patch
    lens_x = 64        # search tokens    -> 8x8 patch
    N = lens_z + lens_x            # M = B*N = 160 -> tm = 80, grid = (2,)

    params = init_params(kp, dim)
    x_v = jax.random.normal(kv, (B, N, dim), jnp.float32)
    x_i = jax.random.normal(ki, (B, N, dim), jnp.float32)

    fwd = jax.jit(fuision_forward, static_argnames=("lens_z",))
    out = jax.block_until_ready(fwd(params, x_v, x_i, lens_z=lens_z))
    assert out.shape == (B, N, dim)

    ref = reference_forward(params, x_v, x_i, lens_z)
    diff = float(np.max(np.abs(np.asarray(out) - np.asarray(ref))))
    # bf16 MXU inputs (f32 accumulation) + tanh-approx GELU vs the exact-f32
    # reference: still tight agreement.
    assert np.allclose(np.asarray(out), np.asarray(ref), rtol=2e-2, atol=3e-2), (
        "max abs diff = %g" % diff)

    print("KERNEL_OK")
</pallas_src>

<mosaic_0001>
module attributes {stable_mosaic.version = 11 : i64} {
  func.func @_fused_kernel(%arg0: i32, %arg1: memref<80x128xf32, #tpu.memory_space<vmem>>, %arg2: memref<80x128xf32, #tpu.memory_space<vmem>>, %arg3: memref<80x128xf32, #tpu.memory_space<vmem>>, %arg4: memref<128x256xbf16, #tpu.memory_space<vmem>>, %arg5: memref<1x256xf32, #tpu.memory_space<vmem>>, %arg6: memref<256x128xbf16, #tpu.memory_space<vmem>>, %arg7: memref<1x128xf32, #tpu.memory_space<vmem>>, %arg8: memref<1x128xf32, #tpu.memory_space<vmem>>, %arg9: memref<1x128xf32, #tpu.memory_space<vmem>>, %arg10: memref<80x128xf32, #tpu.memory_space<vmem>>) attributes {dimension_semantics = [#tpu.dimension_semantics<parallel>], iteration_bounds = array<i64: 2>, scalar_prefetch = 0 : i64, scratch_operands = 0 : i64, tpu.core_type = #tpu.core_type<tc>, window_params = [{transform_indices = @transform_0, window_bounds = array<i64: 80, 128>}, {transform_indices = @transform_1, window_bounds = array<i64: 80, 128>}, {transform_indices = @transform_2, window_bounds = array<i64: 80, 128>}, {pipeline_mode = #tpu.pipeline_mode<synchronous>, transform_indices = @transform_3, window_bounds = array<i64: 128, 256>}, {pipeline_mode = #tpu.pipeline_mode<synchronous>, transform_indices = @transform_4, window_bounds = array<i64: 1, 256>}, {pipeline_mode = #tpu.pipeline_mode<synchronous>, transform_indices = @transform_5, window_bounds = array<i64: 256, 128>}, {pipeline_mode = #tpu.pipeline_mode<synchronous>, transform_indices = @transform_6, window_bounds = array<i64: 1, 128>}, {pipeline_mode = #tpu.pipeline_mode<synchronous>, transform_indices = @transform_7, window_bounds = array<i64: 1, 128>}, {pipeline_mode = #tpu.pipeline_mode<synchronous>, transform_indices = @transform_8, window_bounds = array<i64: 1, 128>}, {transform_indices = @transform_9, window_bounds = array<i64: 80, 128>}]} {
    %c0 = arith.constant 0 : index
    %c0_0 = arith.constant 0 : index
    %0 = vector.load %arg1[%c0, %c0_0] : memref<80x128xf32, #tpu.memory_space<vmem>>, vector<80x128xf32>
    %c0_1 = arith.constant 0 : index
    %c0_2 = arith.constant 0 : index
    %1 = vector.load %arg2[%c0_1, %c0_2] : memref<80x128xf32, #tpu.memory_space<vmem>>, vector<80x128xf32>
    %c0_3 = arith.constant 0 : index
    %c0_4 = arith.constant 0 : index
    %2 = vector.load %arg3[%c0_3, %c0_4] : memref<80x128xf32, #tpu.memory_space<vmem>>, vector<80x128xf32>
    %cst = arith.constant 2.000000e+00 : f32
    %3 = vector.broadcast %cst : f32 to vector<80x128xf32>
    %4 = arith.mulf %3, %0 : vector<80x128xf32>
    %5 = arith.addf %4, %1 : vector<80x128xf32>
    %6 = arith.addf %5, %2 : vector<80x128xf32>
    %7 = arith.truncf %6 : vector<80x128xf32> to vector<80x128xbf16>
    %c0_5 = arith.constant 0 : index
    %c0_6 = arith.constant 0 : index
    %8 = vector.load %arg4[%c0_5, %c0_6] : memref<128x256xbf16, #tpu.memory_space<vmem>>, vector<128x256xbf16>
    %cst_7 = arith.constant dense<0.000000e+00> : vector<80x256xf32>
    %9 = tpu.matmul %7, %8, %cst_7 {dimension_numbers = #tpu.dot_dimension_numbers<[1], [0], [0], [1], [0, 0, 1, 1], [], []>} : vector<80x128xbf16>, vector<128x256xbf16>, vector<80x256xf32> -> vector<80x256xf32>
    %c0_8 = arith.constant 0 : index
    %c0_9 = arith.constant 0 : index
    %10 = vector.load %arg5[%c0_8, %c0_9] : memref<1x256xf32, #tpu.memory_space<vmem>>, vector<1x256xf32>
    %11 = vector.broadcast %10 : vector<1x256xf32> to vector<80x256xf32>
    %12 = arith.addf %9, %11 : vector<80x256xf32>
    %13 = arith.mulf %12, %12 : vector<80x256xf32>
    %14 = arith.mulf %12, %13 : vector<80x256xf32>
    %cst_10 = arith.constant 4.471500e-02 : f32
    %15 = vector.broadcast %cst_10 : f32 to vector<80x256xf32>
    %16 = arith.mulf %15, %14 : vector<80x256xf32>
    %17 = arith.addf %12, %16 : vector<80x256xf32>
    %cst_11 = arith.constant 0.797884583 : f32
    %18 = vector.broadcast %cst_11 : f32 to vector<80x256xf32>
    %19 = arith.mulf %18, %17 : vector<80x256xf32>
    %20 = math.tanh %19 : vector<80x256xf32>
    %cst_12 = arith.constant 1.000000e+00 : f32
    %21 = vector.broadcast %cst_12 : f32 to vector<80x256xf32>
    %22 = arith.addf %21, %20 : vector<80x256xf32>
    %cst_13 = arith.constant 5.000000e-01 : f32
    %23 = vector.broadcast %cst_13 : f32 to vector<80x256xf32>
    %24 = arith.mulf %23, %22 : vector<80x256xf32>
    %25 = arith.mulf %12, %24 : vector<80x256xf32>
    %26 = arith.truncf %25 : vector<80x256xf32> to vector<80x256xbf16>
    %c0_14 = arith.constant 0 : index
    %c0_15 = arith.constant 0 : index
    %27 = vector.load %arg6[%c0_14, %c0_15] : memref<256x128xbf16, #tpu.memory_space<vmem>>, vector<256x128xbf16>
    %cst_16 = arith.constant dense<0.000000e+00> : vector<80x128xf32>
    %28 = tpu.matmul %26, %27, %cst_16 {dimension_numbers = #tpu.dot_dimension_numbers<[1], [0], [0], [1], [0, 0, 1, 1], [], []>} : vector<80x256xbf16>, vector<256x128xbf16>, vector<80x128xf32> -> vector<80x128xf32>
    %c0_17 = arith.constant 0 : index
    %c0_18 = arith.constant 0 : index
    %29 = vector.load %arg7[%c0_17, %c0_18] : memref<1x128xf32, #tpu.memory_space<vmem>>, vector<1x128xf32>
    %30 = vector.broadcast %29 : vector<1x128xf32> to vector<80x128xf32>
    %31 = arith.addf %28, %30 : vector<80x128xf32>
    %cst_19 = arith.constant dense<0.000000e+00> : vector<80xf32>
    %32 = vector.multi_reduction <add>, %31, %cst_19 [1] : vector<80x128xf32> to vector<80xf32>
    %33 = vector.shape_cast %32 : vector<80xf32> to vector<80x1xf32>
    %cst_20 = arith.constant 1.280000e+02 : f32
    %34 = vector.broadcast %cst_20 : f32 to vector<80x1xf32>
    %35 = arith.divf %33, %34 : vector<80x1xf32>
    %36 = vector.broadcast %35 : vector<80x1xf32> to vector<80x128xf32>
    %37 = arith.subf %31, %36 : vector<80x128xf32>
    %38 = arith.mulf %37, %37 : vector<80x128xf32>
    %cst_21 = arith.constant dense<0.000000e+00> : vector<80xf32>
    %39 = vector.multi_reduction <add>, %38, %cst_21 [1] : vector<80x128xf32> to vector<80xf32>
    %40 = vector.shape_cast %39 : vector<80xf32> to vector<80x1xf32>
    %cst_22 = arith.constant 1.280000e+02 : f32
    %41 = vector.broadcast %cst_22 : f32 to vector<80x1xf32>
    %42 = arith.divf %40, %41 : vector<80x1xf32>
    %cst_23 = arith.constant 9.99999974E-6 : f32
    %43 = vector.broadcast %cst_23 : f32 to vector<80x1xf32>
    %44 = arith.addf %42, %43 : vector<80x1xf32>
    %45 = math.rsqrt %44 : vector<80x1xf32>
    %46 = vector.broadcast %45 : vector<80x1xf32> to vector<80x128xf32>
    %47 = arith.mulf %37, %46 : vector<80x128xf32>
    %c0_24 = arith.constant 0 : index
    %c0_25 = arith.constant 0 : index
    %48 = vector.load %arg8[%c0_24, %c0_25] : memref<1x128xf32, #tpu.memory_space<vmem>>, vector<1x128xf32>
    %49 = vector.broadcast %48 : vector<1x128xf32> to vector<80x128xf32>
    %50 = arith.mulf %47, %49 : vector<80x128xf32>
    %c0_26 = arith.constant 0 : index
    %c0_27 = arith.constant 0 : index
    %51 = vector.load %arg9[%c0_26, %c0_27] : memref<1x128xf32, #tpu.memory_space<vmem>>, vector<1x128xf32>
    %52 = vector.broadcast %51 : vector<1x128xf32> to vector<80x128xf32>
    %53 = arith.addf %50, %52 : vector<80x128xf32>
    %54 = arith.addf %6, %53 : vector<80x128xf32>
    %c0_28 = arith.constant 0 : index
    %c0_29 = arith.constant 0 : index
    %55 = vector.load %arg10[%c0_28, %c0_29] : memref<80x128xf32, #tpu.memory_space<vmem>>, vector<80x128xf32>
    tpu.vector_store %arg10[%c0_28, %c0_29], %54 {strides = array<i32>} : memref<80x128xf32, #tpu.memory_space<vmem>>, vector<80x128xf32>,
    return
  }
  func.func @transform_0(%arg0: i32) -> (i32, i32) {
    %c0_i32 = arith.constant 0 : i32
    %c0_i32_0 = arith.constant 0 : i32
    return %arg0, %c0_i32 : i32, i32
  }
  func.func @transform_1(%arg0: i32) -> (i32, i32) {
    %c0_i32 = arith.constant 0 : i32
    %c0_i32_0 = arith.constant 0 : i32
    return %arg0, %c0_i32 : i32, i32
  }
  func.func @transform_2(%arg0: i32) -> (i32, i32) {
    %c0_i32 = arith.constant 0 : i32
    %c0_i32_0 = arith.constant 0 : i32
    return %arg0, %c0_i32 : i32, i32
  }
  func.func @transform_3(%arg0: i32) -> (i32, i32) {
    %c0_i32 = arith.constant 0 : i32
    %c0_i32_0 = arith.constant 0 : i32
    %c0_i32_1 = arith.constant 0 : i32
    return %c0_i32, %c0_i32_0 : i32, i32
  }
  func.func @transform_4(%arg0: i32) -> (i32, i32) {
    %c0_i32 = arith.constant 0 : i32
    %c0_i32_0 = arith.constant 0 : i32
    %c0_i32_1 = arith.constant 0 : i32
    return %c0_i32, %c0_i32_0 : i32, i32
  }
  func.func @transform_5(%arg0: i32) -> (i32, i32) {
    %c0_i32 = arith.constant 0 : i32
    %c0_i32_0 = arith.constant 0 : i32
    %c0_i32_1 = arith.constant 0 : i32
    return %c0_i32, %c0_i32_0 : i32, i32
  }
  func.func @transform_6(%arg0: i32) -> (i32, i32) {
    %c0_i32 = arith.constant 0 : i32
    %c0_i32_0 = arith.constant 0 : i32
    %c0_i32_1 = arith.constant 0 : i32
    return %c0_i32, %c0_i32_0 : i32, i32
  }
  func.func @transform_7(%arg0: i32) -> (i32, i32) {
    %c0_i32 = arith.constant 0 : i32
    %c0_i32_0 = arith.constant 0 : i32
    %c0_i32_1 = arith.constant 0 : i32
    return %c0_i32, %c0_i32_0 : i32, i32
  }
  func.func @transform_8(%arg0: i32) -> (i32, i32) {
    %c0_i32 = arith.constant 0 : i32
    %c0_i32_0 = arith.constant 0 : i32
    %c0_i32_1 = arith.constant 0 : i32
    return %c0_i32, %c0_i32_0 : i32, i32
  }
  func.func @transform_9(%arg0: i32) -> (i32, i32) {
    %c0_i32 = arith.constant 0 : i32
    %c0_i32_0 = arith.constant 0 : i32
    return %arg0, %c0_i32 : i32, i32
  }
}

</mosaic_0001>

<bundles_post_ra>
// kernel: fuision_forward.1
= control target key start
LH: loop header
LB: loop body
LE: loop exit
PB: predicated region body
PF: predicated region fallthrough
CT: control target
= control target key end

     0   :  { %14 = vsyncpa [#allocation3], 0  ;;  %s2215_s0 = inlined_call_operand.vmem [shape: f32[160,128], index: 0, kind: input, shape index: {}]   ;;  %s2216_s1 = inlined_call_operand.vmem [shape: f32[160,128], index: 1, kind: input, shape index: {}]   ;;  %s2217_s2 = inlined_call_operand.vmem [shape: f32[160,128], index: 2, kind: input, shape index: {}]   ;;  %s2218_s3 = inlined_call_operand.vmem [shape: bf16[128,256], index: 3, kind: input, shape index: {}]   ;;  %s2219_s4 = inlined_call_operand.vmem [shape: f32[1,256], index: 4, kind: input, shape index: {}]   ;;  %s2220_s5 = inlined_call_operand.vmem [shape: bf16[256,128], index: 5, kind: input, shape index: {}]   ;;  %s2221_s6 = inlined_call_operand.vmem [shape: f32[1,128], index: 6, kind: input, shape index: {}]   ;;  %s2222_s7 = inlined_call_operand.vmem [shape: f32[1,128], index: 7, kind: input, shape index: {}]   ;;  %s2223_s8 = inlined_call_operand.vmem [shape: f32[1,128], index: 8, kind: input, shape index: {}]   ;;  %s2224_s9 = inlined_call_operand.hbm [shape: f32[160,128], index: 9, kind: output, shape index: {}]  }
   0x1   :  { %16 = vsyncpa [#allocation3 + $0x1], 0  ;;  %s1651_s30 = smov 0   ;;  %s1653_s10 = smov 0  }
   0x2   :  { %s1655_s11 = smov 0   ;;  %s1657_s12 = smov 0  }
   0x3 LB: > { %s1672_s13 = sadd.s32 4294967295, %s1595_s12   ;;  %s1298_s14 = sadd.s32 4294967294, %s1595_s12   ;;  %s1595_s12 = sphi %s1657_s12, %s2230_s12   ;;  %s1591_s11 = sphi %s1655_s11, %s2229_s11   ;;  %s1587_s10 = sphi %s1653_s10, %s2228_s10   ;;  %s1583_s30 = sphi %s1651_s30, %s2227_s30  }
   0x4   : > { %s1676_s15 = sadd.s32 1, %s1595_s12   ;;  %s233_s16 = sadd.s32 1, %s1591_s11 }
   0x5   : > { %s230_s17 = ssub.s32 %s1595_s12, %s1676_s15  ;;  %p243_p0 = scmp.ne.s32.totalorder %s1591_s11, %s1587_s10 }
   0x6   : > { %p231_p1 = scmp.eq.s32.totalorder %s230_s17, 0  ;;  %p244_p2 = scmp.eq.s32.totalorder %s1672_s13, 1 }
   0x7   : > { %p249_p3 = scmp.ne.s32.totalorder %s1587_s10, %s1583_s30  ;;  %p250_p4 = scmp.eq.s32.totalorder %s1298_s14, 1 }
   0x8   : > { %s1687_s18 = scalar_select %p231_p1, %s1591_s11, %s233_s16  }
   0x9   : > { %p1689_p5 = por %p244_p2, %p243_p0  ;;  %p1693_p6 = por %p250_p4, %p249_p3 }
   0xa   : > { %p1301_p7 = scmp.ge.s32.totalorder %s1595_s12, 1  ;;  %p313_p8 = scmp.lt.s32.totalorder %s1595_s12, 3 }
   0xc   : > { %p314_p9 = pnand %p1301_p7, %p313_p8 }
   0xd   : > { %v1433_v0 = vld [vmem:[%s2218_s3 + $0x4] ss:$8 sps:$4 sm:$0xff] (!%p314_p9)   ;;  %s359_s23 = smul.u32 (!%p314_p9), 10, %s1672_s13  ;;  %v1435_v1 = vld [vmem:[%s2218_s3] ss:$8 sps:$4 sm:$0xff] (!%p314_p9)   ;;  %v1597_v2 = vmov (!%p314_p9), 0  }
   0xe   : > { %317 = sbr.rel (%p314_p9) target bundleno = 883 (0x373), region = 56  ;;  %584 = vmatprep.mubr.bf16.mxu0 (!%p314_p9), %v1597_v2  ;;  %552 = vmatprep.subr.bf16.mxu0 (!%p314_p9), %v1433_v0  ;;  %v1436_v3 = vld [vmem:[%s2218_s3 + $0x14] ss:$8 sps:$4 sm:$0xff] (!%p314_p9)   ;;  %v1438_v4 = vld [vmem:[%s2218_s3 + $0x10] ss:$8 sps:$4 sm:$0xff] (!%p314_p9)   ;;  %s1598_s21 = smov (!%p314_p9), [#allocation2]  }
   0xf   : > { %p360_p10 = scmp.lt.s32.totalorder (!%p314_p9), %s359_s23, 19  ;;  %553 = vmatpush1.bf16.msra.mxu0 (!%p314_p9), %v1435_v1  ;;  %v1439_v5 = vld [vmem:[%s2218_s3 + $0x24] ss:$8 sps:$4 sm:$0xff] (!%p314_p9)   ;;  %v1441_v6 = vld [vmem:[%s2218_s3 + $0x20] ss:$8 sps:$4 sm:$0xff] (!%p314_p9)   ;;  %s1343_s26 = smul.u32 (!%p314_p9), 1280, %s1672_s13 }
  0x10   : > { %554 = vmatprep.subr.bf16.mxu0 (!%p314_p9), %v1436_v3  ;;  %v1442_v7 = vld [vmem:[%s2218_s3 + $0x34] ss:$8 sps:$4 sm:$0xff] (!%p314_p9)   ;;  %v1444_v8 = vld [vmem:[%s2218_s3 + $0x30] ss:$8 sps:$4 sm:$0xff] (!%p314_p9)   ;;  %v1445_v9 = vld [vmem:[%s2218_s3 + $0x44] ss:$8 sps:$4 sm:$0xff] (!%p314_p9)  }
  0x11   : > { %v1447_v10 = vld [vmem:[%s2218_s3 + $0x40] ss:$8 sps:$4 sm:$0xff] (!%p314_p9)   ;;  %v1448_v13 = vld [vmem:[%s2218_s3 + $0x54] ss:$8 sps:$4 sm:$0xff] (!%p314_p9)   ;;  %v1450_v18 = vld [vmem:[%s2218_s3 + $0x50] ss:$8 sps:$4 sm:$0xff] (!%p314_p9)  }
  0x12   : > { %v1451_v21 = vld [vmem:[%s2218_s3 + $0x64] ss:$8 sps:$4 sm:$0xff] (!%p314_p9)   ;;  %v1453_v24 = vld [vmem:[%s2218_s3 + $0x60] ss:$8 sps:$4 sm:$0xff] (!%p314_p9)   ;;  %v1454_v27 = vld [vmem:[%s2218_s3 + $0x74] ss:$8 sps:$4 sm:$0xff] (!%p314_p9)  }
  0x13   : > { %555 = vmatpush1.bf16.msra.mxu0 (!%p314_p9), %v1438_v4  ;;  %v1456_v30 = vld [vmem:[%s2218_s3 + $0x70] ss:$8 sps:$4 sm:$0xff] (!%p314_p9)   ;;  %s1537_s22 = sshll.u32 (!%p314_p9), %s1598_s21, 4  ;;  %s1538_s22 = int_to_ptr.vmem [resolvable:$false] %s1537_s22 }
  0x14   : > { %556 = vmatprep.subr.bf16.mxu0 (!%p314_p9), %v1439_v5 }
  0x15   : > { %s2232_s23 = smov (!%p360_p10, %s359_s23), 19 }
  0x16   : > { %s1302_s25 = sshll.u32 %s2232_s23, 3  ;;  %s2169_s23 = scalar_lea.hbm %s2224_s9, %s1343_s26 }
  0x17   : > { %557 = vmatpush1.bf16.msra.mxu0 %v1441_v6  ;;  %s1731_s17 = scalar_lea.vmem %s2215_s0, %s1302_s25  ;;  %s1744_s28 = scalar_lea.vmem %s2216_s1, %s1302_s25 }
  0x18   : > { %558 = vmatprep.subr.bf16.mxu0 %v1442_v7  ;;  %v379_v11 = vld [vmem:[%s1731_s17] sm:$0xff]  ;;  %v380_v12 = vld [vmem:[%s1731_s17 + $0x8] sm:$0xff]  ;;  %v381_v14 = vld [vmem:[%s1731_s17 + $0x10] sm:$0xff]  ;;  %s1751_s16 = scalar_lea.vmem %s2217_s2, %s1302_s25 }
  0x19   : > { %v382_v15 = vld [vmem:[%s1731_s17 + $0x18] sm:$0xff]  ;;  %v409_v16 = vmul.f32 2.0, %v379_v11  ;;  %v410_v17 = vmul.f32 2.0, %v380_v12  ;;  %v389_v19 = vld [vmem:[%s1744_s28] sm:$0xff]  ;;  %v390_v20 = vld [vmem:[%s1744_s28 + $0x8] sm:$0xff]  ;;  %v411_v22 = vmul.f32 2.0, %v381_v14 }
  0x1a   : > { %v412_v23 = vmul.f32 2.0, %v382_v15  ;;  %v399_v25 = vld [vmem:[%s1751_s16] sm:$0xff]  ;;  %v400_v26 = vld [vmem:[%s1751_s16 + $0x8] sm:$0xff]  ;;  %v391_v31 = vld [vmem:[%s1744_s28 + $0x10] sm:$0xff] }
  0x1b   : > { %559 = vmatpush1.bf16.msra.mxu0 %v1444_v8  ;;  %v419_v28 = vadd.f32 %v409_v16, %v389_v19  ;;  %v420_v29 = vadd.f32 %v410_v17, %v390_v20  ;;  %v392_v32 = vld [vmem:[%s1744_s28 + $0x18] sm:$0xff]  ;;  %v401_v35 = vld [vmem:[%s1751_s16 + $0x10] sm:$0xff]  ;;  %v383_v37 = vld [vmem:[%s1731_s17 + $0x20] sm:$0xff]  ;;  %v421_v39 = vadd.f32 %v411_v22, %v391_v31 }
  0x1c   : > { %560 = vmatprep.subr.bf16.mxu0 %v1445_v9  ;;  %v402_v36 = vld [vmem:[%s1751_s16 + $0x18] sm:$0xff]  ;;  %v422_v40 = vadd.f32 %v412_v23, %v392_v32  ;;  %v384_v41 = vld [vmem:[%s1731_s17 + $0x28] sm:$0xff]  ;;  %v413_v44 = vmul.f32 2.0, %v383_v37  ;;  %v393_v46 = vld [vmem:[%s1744_s28 + $0x20] sm:$0xff] }
  0x1d   : > { %v1774_v33 = vadd.f32 %v419_v28, %v399_v25  ;;  %v1776_v34 = vadd.f32 %v420_v29, %v400_v26  ;;  %v1784_v42 = vadd.f32 %v421_v39, %v401_v35  ;;  %v414_v45 = vmul.f32 2.0, %v384_v41  ;;  %v394_v47 = vld [vmem:[%s1744_s28 + $0x28] sm:$0xff]  ;;  %v403_v49 = vld [vmem:[%s1751_s16 + $0x20] sm:$0xff]  ;;  %v385_v53 = vld [vmem:[%s1731_s17 + $0x30] sm:$0xff] }
  0x1e   : > { %v1786_v43 = vadd.f32 %v422_v40, %v402_v36  ;;  %v423_v50 = vadd.f32 %v413_v44, %v393_v46  ;;  %v404_v52 = vld [vmem:[%s1751_s16 + $0x28] sm:$0xff]  ;;  %v386_v54 = vld [vmem:[%s1731_s17 + $0x38] sm:$0xff]  ;;  %v415_v57 = vmul.f32 2.0, %v385_v53  ;;  %v395_v59 = vld [vmem:[%s1744_s28 + $0x30] sm:$0xff]  ;;  %v462_v36 = vlaneseq }
  0x1f   : > { %561 = vmatpush1.bf16.msra.mxu0 %v1447_v10  ;;  %v439_v38 = vpack.c.bf16 %v1776_v34, %v1774_v33  ;;  %v424_v51 = vadd.f32 %v414_v45, %v394_v47  ;;  %v416_v58 = vmul.f32 2.0, %v386_v54  ;;  %v396_v60 = vld [vmem:[%s1744_s28 + $0x38] sm:$0xff]  ;;  %v405_v62 = vld [vmem:[%s1751_s16 + $0x30] sm:$0xff]  ;;  %v387_v3 = vld [vmem:[%s1731_s17 + $0x40] sm:$0xff] }
  0x20   : > { %562 = vmatprep.subr.bf16.mxu0 %v1448_v13  ;;  %v440_v48 = vpack.c.bf16 %v1786_v43, %v1784_v42  ;;  %v1797_v55 = vadd.f32 %v423_v50, %v403_v49  ;;  %v425_v63 = vadd.f32 %v415_v57, %v395_v59  ;;  %v406_v1 = vld [vmem:[%s1751_s16 + $0x38] sm:$0xff]  ;;  %v388_v4 = vld [vmem:[%s1731_s17 + $0x48] sm:$0xff]  ;;  %v417_v7 = vmul.f32 2.0, %v387_v3  ;;  %v397_v9 = vld [vmem:[%s1744_s28 + $0x40] sm:$0xff]  ;;  %s356_s17 = sand.u32 1, %s1587_s10  }
  0x21   : > { %v1799_v56 = vadd.f32 %v424_v51, %v404_v52  ;;  %v426_v0 = vadd.f32 %v416_v58, %v396_v60  ;;  %v418_v8 = vmul.f32 2.0, %v388_v4  ;;  %v398_v10 = vld [vmem:[%s1744_s28 + $0x48] sm:$0xff]  ;;  %v407_v14 = vld [vmem:[%s1751_s16 + $0x40] sm:$0xff]  ;;  %v1461_v22 = vld [vmem:[%s2220_s5 + $0x50] sm:$0xff]   ;;  %v463_v37 = vshrl.u32 %v462_v36, 7  ;;  %s1390_s24 = smul.u32 80, %s356_s17 }
  0x22   : > { %v1810_v5 = vadd.f32 %v425_v63, %v405_v62  ;;  %v427_v12 = vadd.f32 %v417_v7, %v397_v9  ;;  %v408_v15 = vld [vmem:[%s1751_s16 + $0x48] sm:$0xff]  ;;  %v1457_v19 = vld [vmem:[%s2220_s5 + $0x40] sm:$0xff]   ;;  %v1462_v23 = vld [vmem:[%s2220_s5 + $0x10] sm:$0xff]   ;;  %s2174_s13 = scalar_lea.sflag [#allocation3], %s356_s17  ;;  %s1539_s16 = scalar_lea.vmem %s1538_s22, 2560 }
  0x23   : > { %563 = vmatpush1.bf16.msra.mxu0 %v1450_v18  ;;  %v441_v61 = vpack.c.bf16 %v1799_v56, %v1797_v55  ;;  %v1812_v6 = vadd.f32 %v426_v0, %v406_v1  ;;  %v428_v13 = vadd.f32 %v418_v8, %v398_v10  ;;  %v1458_v20 = vld [vmem:[%s2220_s5] sm:$0xff]   ;;  %1344 = vmatprep.subr.bf16.mxu1 %v1457_v19  ;;  %v1464_v25 = vld [vmem:[%s2220_s5 + $0x18] sm:$0xff]   ;;  %v1467_v28 = vld [vmem:[%s2220_s5 + $0x68] sm:$0xff]   ;;  %v468_v40 = vsub.s32 1, %v463_v37  ;;  %s2117_s25 = scalar_lea.vmem [#allocation2], %s1390_s24 }
  0x24   : > { %564 = vmatprep.subr.bf16.mxu0 %v1451_v21  ;;  %v1821_v16 = vadd.f32 %v427_v12, %v407_v14  ;;  %1345 = vmatpush3.bf16.msra.mxu1 %v1458_v20  ;;  %v1459_v21 = vld [vmem:[%s2220_s5 + $0x48] sm:$0xff]   ;;  %v1465_v26 = vld [vmem:[%s2220_s5 + $0x60] sm:$0xff]   ;;  %v1470_v31 = vld [vmem:[%s2220_s5 + $0x30] sm:$0xff]   ;;  %s1212_s27 = sshll.u32 %s2117_s25, 4  ;;  %s2162_s27 = int_to_ptr.vmem [resolvable:$true] %s1212_s27 }
  0x25   : > { %v442_v11 = vpack.c.bf16 %v1812_v6, %v1810_v5  ;;  %v1823_v17 = vadd.f32 %v428_v13, %v408_v15  ;;  %1346 = vmatprep.subr.bf16.mxu1 %v1459_v21  ;;  %v1468_v29 = vld [vmem:[%s2220_s5 + $0x28] sm:$0xff]   ;;  %v1471_v32 = vld [vmem:[%s2220_s5 + $0x78] sm:$0xff]   ;;  %v460_v39 = vld [vmem:[%s2219_s4] sm:$0x3]  ;;  %s1533_s28 = scalar_lea.vmem %s2162_s27, 1280  ;;  %p1540_p0 = scmp.lt.s32.totalorder %s2162_s27, %s1538_s22 }
  0x26   : > { %v1472_v35 = vld [vmem:[%s2220_s5 + $0x38] sm:$0xff]   ;;  %v1881_v44 = vrot.slane %v460_v39, %v468_v40  ;;  %p1534_p11 = scmp.ne.s32.totalorder %s2162_s27, %s1533_s28  ;;  %p1541_p1 = scmp.lt.s32.totalorder %s1539_s16, %s1533_s28 }
  0x27   : > { %565 = vmatpush1.bf16.msra.mxu0 %v1453_v24  ;;  %v443_v18 = vpack.c.bf16 %v1823_v17, %v1821_v16  ;;  %v1463_v24 = vld [vmem:[%s2220_s5 + $0x58] sm:$0xff]  }
  0x28   : > { %566 = vmatprep.subr.bf16.mxu0 %v1454_v27  ;;  %v1466_v27 = vld [vmem:[%s2220_s5 + $0x20] sm:$0xff]   ;;  %p1535_p12 = pnand %p1534_p11, %p1689_p5  ;;  %p1542_p2 = por %p1541_p1, %p1540_p0 }
  0x2a   : > { %p1536_p13 = pneg %p1535_p12 }
  0x2b   : > { %567 = vmatpush1.bf16.msra.mxu0 %v1456_v30  ;;  %v1469_v30 = vld [vmem:[%s2220_s5 + $0x70] sm:$0xff]  }
  0x2c   : > { %p1543_p3 = pnand %p1542_p2, %p1536_p13 }
  0x2e   : > { %585 = vmatmul.mubr.bf16.vlgmr.msra.gmra.mrb[0].mxu0 %v439_v38  ;;  %v464_v38 = vsub.s32 0, %v463_v37 }
  0x2f   : > { %594 = vmatprep.mubr.bf16.mxu0 %v1597_v2 }
  0x30   : > { %v1879_v41 = vrot.slane %v460_v39, %v464_v38 }
  0x36   : > { %595 = vmatmul.mubr.bf16.gmra.mrb[4].mxu0 %v440_v48 }
  0x37   : > { %604 = vmatprep.mubr.bf16.mxu0 %v1597_v2 }
  0x3e   : > { %605 = vmatmul.mubr.bf16.gmra.mrb[8].mxu0 %v441_v61 }
  0x3f   : > { %614 = vmatprep.mubr.bf16.mxu0 %v1597_v2 }
  0x46   : > { %615 = vmatmul.mubr.bf16.gmra.mrb[12].mxu0 %v442_v11 }
  0x47   : > { %624 = vmatprep.mubr.bf16.mxu0 %v1597_v2  ;;  %v1460_v2 = vld [vmem:[%s2220_s5 + $0x8] sm:$0xff]  }
  0x48   : > { %1347 = vmatpush3.bf16.msra.mxu1 %v1460_v2 }
  0x49   : > { %1348 = vmatprep.subr.bf16.mxu1 %v1461_v22 }
  0x4c   : > { %1349 = vmatpush3.bf16.msra.mxu1 %v1462_v23 }
  0x4d   : > { %1350 = vmatprep.subr.bf16.mxu1 %v1463_v24 }
  0x4e   : > { %625 = vmatmul.mubr.bf16.gmra.mrb[16].mxu0 %v443_v18 }
  0x50   : > { %1351 = vmatpush3.bf16.msra.mxu1 %v1464_v25 }
  0x51   : > { %1352 = vmatprep.subr.bf16.mxu1 %v1465_v26 }
  0x54   : > { %1353 = vmatpush3.bf16.msra.mxu1 %v1466_v27 }
  0x55   : > { %1354 = vmatprep.subr.bf16.mxu1 %v1467_v28 }
  0x58   : > { %1355 = vmatpush3.bf16.msra.mxu1 %v1468_v29 }
  0x59   : > { %1356 = vmatprep.subr.bf16.mxu1 %v1469_v30 }
  0x5c   : > { %1357 = vmatpush3.bf16.msra.mxu1 %v1470_v31 }
  0x5d   : > { %1358 = vmatprep.subr.bf16.mxu1 %v1471_v32 }
  0x60   : > { %1359 = vmatpush3.bf16.msra.mxu1 %v1472_v35 }
 0x101   : > { %v586_v45 = vpop.f32.mrb[0].mxu0 }
 0x102   : > { %v1884_v46 = vadd.f32 %v586_v45, %v1879_v41  ;;  %v588_v47 = vpop.f32.mrb[1].mxu0 }
 0x103   : > { %v1887_v48 = vadd.f32 %v588_v47, %v1881_v44  ;;  %v590_v49 = vpop.f32.mrb[2].mxu0 }
 0x104   : > { %v635_v50 = vmul.f32 %v1884_v46, %v1884_v46  ;;  %v1892_v51 = vadd.f32 %v590_v49, %v1879_v41  ;;  %v592_v52 = vpop.f32.mrb[3].mxu0 }
 0x105   : > { %v636_v53 = vmul.f32 %v1887_v48, %v1887_v48  ;;  %v1897_v54 = vadd.f32 %v592_v52, %v1881_v44 }
 0x106   : > { %v655_v57 = vmul.f32 %v635_v50, %v1884_v46  ;;  %v637_v58 = vmul.f32 %v1892_v51, %v1892_v51 }
 0x107   : > { %v656_v59 = vmul.f32 %v636_v53, %v1887_v48  ;;  %v638_v60 = vmul.f32 %v1897_v54, %v1897_v54 }
 0x108   : > { %v675_v61 = vmul.f32 0.044715, %v655_v57  ;;  %v657_v62 = vmul.f32 %v637_v58, %v1892_v51 }
 0x109   : > { %v676_v63 = vmul.f32 0.044715, %v656_v59  ;;  %v658_v0 = vmul.f32 %v638_v60, %v1897_v54  ;;  %v596_v1 = vpop.f32.mrb[4].mxu0 }
 0x10a   : > { %v695_v3 = vadd.f32 %v675_v61, %v1884_v46  ;;  %v677_v4 = vmul.f32 0.044715, %v657_v62  ;;  %v1909_v7 = vadd.f32 %v596_v1, %v1879_v41  ;;  %v598_v8 = vpop.f32.mrb[5].mxu0 }
 0x10b   : > { %v678_v9 = vmul.f32 0.044715, %v658_v0  ;;  %v1912_v10 = vadd.f32 %v598_v8, %v1881_v44  ;;  %v600_v11 = vpop.f32.mrb[6].mxu0  ;;  %v696_v12 = vadd.f32 %v676_v63, %v1887_v48 }
 0x10c   : > { %v715_v13 = vmul.f32 0.7978846, %v695_v3  ;;  %v697_v14 = vadd.f32 %v677_v4, %v1892_v51  ;;  %v639_v15 = vmul.f32 %v1909_v7, %v1909_v7  ;;  %v1919_v18 = vadd.f32 %v600_v11, %v1879_v41  ;;  %v602_v19 = vpop.f32.mrb[7].mxu0 }
 0x10d   : > { %v640_v20 = vmul.f32 %v1912_v10, %v1912_v10  ;;  %v1924_v21 = vadd.f32 %v602_v19, %v1881_v44  ;;  %v698_v2 = vadd.f32 %v678_v9, %v1897_v54  ;;  %v716_v22 = vmul.f32 0.7978846, %v696_v12 }
 0x10e   : > { %1473 = vtanh.f32 %v715_v13  ;;  %v717_v23 = vmul.f32 0.7978846, %v697_v14  ;;  %v659_v24 = vmul.f32 %v639_v15, %v1909_v7  ;;  %v641_v25 = vmul.f32 %v1919_v18, %v1919_v18 }
 0x10f   : > { %v660_v26 = vmul.f32 %v640_v20, %v1912_v10  ;;  %v642_v27 = vmul.f32 %v1924_v21, %v1924_v21  ;;  %v718_v28 = vmul.f32 0.7978846, %v698_v2  ;;  %1475 = vtanh.f32 %v716_v22 }
 0x110   : > { %1477 = vtanh.f32 %v717_v23  ;;  %v679_v29 = vmul.f32 0.044715, %v659_v24  ;;  %v661_v30 = vmul.f32 %v641_v25, %v1919_v18 }
 0x111   : > { %v680_v31 = vmul.f32 0.044715, %v660_v26  ;;  %v662_v32 = vmul.f32 %v642_v27, %v1924_v21  ;;  %v606_v35 = vpop.f32.mrb[8].mxu0  ;;  %1479 = vtanh.f32 %v718_v28 }
 0x112   : > { %v699_v36 = vadd.f32 %v679_v29, %v1909_v7  ;;  %v681_v37 = vmul.f32 0.044715, %v661_v30  ;;  %v1937_v38 = vadd.f32 %v606_v35, %v1879_v41  ;;  %v608_v39 = vpop.f32.mrb[9].mxu0 }
 0x113   : > { %v700_v40 = vadd.f32 %v680_v31, %v1912_v10  ;;  %v682_v45 = vmul.f32 0.044715, %v662_v32  ;;  %v1941_v47 = vadd.f32 %v608_v39, %v1881_v44  ;;  %v610_v49 = vpop.f32.mrb[10].mxu0 }
 0x114   : > { %v719_v50 = vmul.f32 0.7978846, %v699_v36  ;;  %v701_v52 = vadd.f32 %v681_v37, %v1919_v18  ;;  %v643_v53 = vmul.f32 %v1937_v38, %v1937_v38  ;;  %v1947_v57 = vadd.f32 %v610_v49, %v1879_v41  ;;  %v612_v58 = vpop.f32.mrb[11].mxu0 }
 0x115   : > { %v720_v59 = vmul.f32 0.7978846, %v700_v40  ;;  %v702_v60 = vadd.f32 %v682_v45, %v1924_v21  ;;  %v644_v61 = vmul.f32 %v1941_v47, %v1941_v47  ;;  %v1953_v62 = vadd.f32 %v612_v58, %v1881_v44 }
 0x116   : > { %1481 = vtanh.f32 %v719_v50  ;;  %v721_v63 = vmul.f32 0.7978846, %v701_v52  ;;  %v663_v0 = vmul.f32 %v643_v53, %v1937_v38  ;;  %v645_v1 = vmul.f32 %v1947_v57, %v1947_v57 }
 0x117   : > { %1483 = vtanh.f32 %v720_v59  ;;  %v722_v3 = vmul.f32 0.7978846, %v702_v60  ;;  %v664_v4 = vmul.f32 %v644_v61, %v1941_v47  ;;  %v646_v8 = vmul.f32 %v1953_v62, %v1953_v62 }
 0x118   : > { %v1474_v9 = vpop.eup %1473  ;;  %1485 = vtanh.f32 %v721_v63  ;;  %v683_v11 = vmul.f32 0.044715, %v663_v0  ;;  %v665_v12 = vmul.f32 %v645_v1, %v1947_v57 }
 0x119   : > { %v1476_v13 = vpop.eup %1475  ;;  %1487 = vtanh.f32 %v722_v3  ;;  %v684_v14 = vmul.f32 0.044715, %v664_v4  ;;  %v666_v15 = vmul.f32 %v646_v8, %v1953_v62  ;;  %v616_v19 = vpop.f32.mrb[12].mxu0  ;;  %v1963_v20 = vadd.f32 1.0, %v1474_v9 }
 0x11a   : > { %v1478_v2 = vpop.eup %1477  ;;  %v703_v22 = vadd.f32 %v683_v11, %v1937_v38  ;;  %v685_v23 = vmul.f32 0.044715, %v665_v12  ;;  %v1967_v24 = vadd.f32 %v616_v19, %v1879_v41  ;;  %v618_v25 = vpop.f32.mrb[13].mxu0  ;;  %v756_v26 = vadd.f32 1.0, %v1476_v13 }
 0x11b   : > { %v704_v27 = vadd.f32 %v684_v14, %v1941_v47  ;;  %v686_v28 = vmul.f32 0.044715, %v666_v15  ;;  %v1971_v29 = vadd.f32 %v618_v25, %v1881_v44  ;;  %v620_v30 = vpop.f32.mrb[14].mxu0  ;;  %v1973_v31 = vadd.f32 1.0, %v1478_v2  ;;  %v1480_v40 = vpop.eup %1479 }
 0x11c   : > { %v723_v32 = vmul.f32 0.7978846, %v703_v22  ;;  %v705_v35 = vadd.f32 %v685_v23, %v1947_v57  ;;  %v647_v36 = vmul.f32 %v1967_v24, %v1967_v24  ;;  %v1979_v37 = vadd.f32 %v620_v30, %v1879_v41  ;;  %v622_v39 = vpop.f32.mrb[15].mxu0 }
 0x11d   : > { %v724_v45 = vmul.f32 0.7978846, %v704_v27  ;;  %v706_v49 = vadd.f32 %v686_v28, %v1953_v62  ;;  %v648_v50 = vmul.f32 %v1971_v29, %v1971_v29  ;;  %v1985_v52 = vadd.f32 %v622_v39, %v1881_v44 }
 0x11e   : > { %1489 = vtanh.f32 %v723_v32  ;;  %v725_v53 = vmul.f32 0.7978846, %v705_v35  ;;  %v667_v58 = vmul.f32 %v647_v36, %v1967_v24  ;;  %v649_v59 = vmul.f32 %v1979_v37, %v1979_v37 }
 0x11f   : > { %1491 = vtanh.f32 %v724_v45  ;;  %v726_v60 = vmul.f32 0.7978846, %v706_v49  ;;  %v668_v61 = vmul.f32 %v648_v50, %v1971_v29  ;;  %v650_v63 = vmul.f32 %v1985_v52, %v1985_v52 }
 0x120   : > { %v1993_v0 = vpop.eup %1481  ;;  %1493 = vtanh.f32 %v725_v53  ;;  %v687_v1 = vmul.f32 0.044715, %v667_v58  ;;  %v669_v3 = vmul.f32 %v649_v59, %v1979_v37  ;;  %v758_v4 = vadd.f32 1.0, %v1480_v40 }
 0x121   : > { %v1484_v8 = vpop.eup %1483  ;;  %1495 = vtanh.f32 %v726_v60  ;;  %v688_v9 = vmul.f32 0.044715, %v668_v61  ;;  %v670_v11 = vmul.f32 %v650_v63, %v1985_v52  ;;  %v626_v12 = vpop.f32.mrb[16].mxu0  ;;  %v776_v13 = vmul.f32 0.5, %v756_v26 }
 0x122   : > { %v1997_v14 = vpop.eup %1485  ;;  %v707_v15 = vadd.f32 %v687_v1, %v1967_v24  ;;  %v689_v19 = vmul.f32 0.044715, %v669_v3  ;;  %v2001_v2 = vadd.f32 %v626_v12, %v1879_v41  ;;  %v628_v22 = vpop.f32.mrb[17].mxu0  ;;  %v778_v23 = vmul.f32 0.5, %v758_v4 }
 0x123   : > { %v1488_v25 = vpop.eup %1487  ;;  %v708_v27 = vadd.f32 %v688_v9, %v1971_v29  ;;  %v690_v28 = vmul.f32 0.044715, %v670_v11  ;;  %v2005_v30 = vadd.f32 %v628_v22, %v1881_v44  ;;  %v630_v32 = vpop.f32.mrb[18].mxu0  ;;  %v796_v26 = vmul.f32 %v776_v13, %v1887_v48 }
 0x124   : > { %v727_v35 = vmul.f32 0.7978846, %v707_v15  ;;  %v709_v36 = vadd.f32 %v689_v19, %v1979_v37  ;;  %v651_v39 = vmul.f32 %v2001_v2, %v2001_v2  ;;  %v2012_v40 = vadd.f32 %v630_v32, %v1879_v41  ;;  %v632_v45 = vpop.f32.mrb[19].mxu0 }
 0x125   : > { %v728_v49 = vmul.f32 0.7978846, %v708_v27  ;;  %v710_v50 = vadd.f32 %v690_v28, %v1985_v52  ;;  %v652_v53 = vmul.f32 %v2005_v30, %v2005_v30  ;;  %v2018_v58 = vadd.f32 %v632_v45, %v1881_v44 }
 0x126   : > { %1497 = vtanh.f32 %v727_v35  ;;  %v729_v48 = vmul.f32 0.7978846, %v709_v36  ;;  %v671_v59 = vmul.f32 %v651_v39, %v2001_v2  ;;  %v653_v60 = vmul.f32 %v2012_v40, %v2012_v40 }
 0x127   : > { %1499 = vtanh.f32 %v728_v49  ;;  %v730_v41 = vmul.f32 0.7978846, %v710_v50  ;;  %v672_v61 = vmul.f32 %v652_v53, %v2005_v30  ;;  %v654_v63 = vmul.f32 %v2018_v58, %v2018_v58 }
 0x128   : > { %v1490_v1 = vpop.eup %1489  ;;  %1501 = vtanh.f32 %v729_v48  ;;  %v691_v3 = vmul.f32 0.044715, %v671_v59  ;;  %v673_v44 = vmul.f32 %v653_v60, %v2012_v40  ;;  %v798_v4 = vmul.f32 %v778_v23, %v1897_v54 }
 0x129   : > { %v1492_v9 = vpop.eup %1491  ;;  %1503 = vtanh.f32 %v730_v41  ;;  %v692_v11 = vmul.f32 0.044715, %v672_v61  ;;  %v674_v12 = vmul.f32 %v654_v63, %v2018_v58  ;;  %v775_v13 = vmul.f32 0.5, %v1963_v20 }
 0x12a   : > { %v1494_v15 = vpop.eup %1493  ;;  %v711_v19 = vadd.f32 %v691_v3, %v2001_v2  ;;  %v693_v22 = vmul.f32 0.044715, %v673_v44  ;;  %v816_v27 = vpack.c.bf16 %v798_v4, %v796_v26  ;;  %v777_v28 = vmul.f32 0.5, %v1973_v31 }
 0x12b   : > { %v1496_v32 = vpop.eup %1495  ;;  %v712_v35 = vadd.f32 %v692_v11, %v2005_v30  ;;  %v694_v36 = vmul.f32 0.044715, %v674_v12  ;;  %v795_v54 = vmul.f32 %v775_v13, %v1884_v46  ;;  %v760_v23 = vadd.f32 1.0, %v1484_v8 }
 0x12c   : > { %v731_v39 = vmul.f32 0.7978846, %v711_v19  ;;  %v713_v45 = vadd.f32 %v693_v22, %v2012_v40  ;;  %992 = vmatprep.mubr.bf16.mxu1 %v816_v27  ;;  %v797_v20 = vmul.f32 %v777_v28, %v1892_v51  ;;  %v762_v49 = vadd.f32 1.0, %v1488_v25 }
 0x12d   : > { %v732_v50 = vmul.f32 0.7978846, %v712_v35  ;;  %v714_v53 = vadd.f32 %v694_v36, %v2018_v58  ;;  %v780_v26 = vmul.f32 0.5, %v760_v23  ;;  %v759_v31 = vadd.f32 1.0, %v1993_v0 }
 0x12e   : > { %1505 = vtanh.f32 %v731_v39  ;;  %v733_v48 = vmul.f32 0.7978846, %v713_v45  ;;  %v815_v59 = vpack.c.bf16 %v797_v20, %v795_v54  ;;  %v782_v60 = vmul.f32 0.5, %v762_v49 }
 0x12f   : > { %1507 = vtanh.f32 %v732_v50  ;;  %v734_v46 = vmul.f32 0.7978846, %v714_v53  ;;  %v800_v8 = vmul.f32 %v780_v26, %v1912_v10  ;;  %v761_v41 = vadd.f32 1.0, %v1997_v14 }
 0x130   : > { %v1498_v61 = vpop.eup %1497  ;;  %1509 = vtanh.f32 %v733_v48  ;;  %993 = vmatmul.mubr.bf16.vlgmr.msra.gmra.mrb[0].mxu1 %v815_v59  ;;  %v802_v51 = vmul.f32 %v782_v60, %v1924_v21  ;;  %v779_v25 = vmul.f32 0.5, %v759_v31  ;;  %v764_v63 = vadd.f32 1.0, %v1492_v9 }
 0x131   : > { %v1500_v3 = vpop.eup %1499  ;;  %1511 = vtanh.f32 %v734_v46  ;;  %v781_v0 = vmul.f32 0.5, %v761_v41  ;;  %v766_v44 = vadd.f32 1.0, %v1496_v32  ;;  %v763_v4 = vadd.f32 1.0, %v1490_v1 }
 0x132   : > { %v1502_v11 = vpop.eup %1501  ;;  %v818_v12 = vpack.c.bf16 %v802_v51, %v800_v8  ;;  %v799_v13 = vmul.f32 %v779_v25, %v1909_v7  ;;  %v784_v19 = vmul.f32 0.5, %v764_v63  ;;  %v765_v10 = vadd.f32 1.0, %v1494_v15 }
 0x133   : > { %v1504_v22 = vpop.eup %1503  ;;  %v801_v14 = vmul.f32 %v781_v0, %v1919_v18  ;;  %v786_v27 = vmul.f32 0.5, %v766_v44  ;;  %v783_v28 = vmul.f32 0.5, %v763_v4  ;;  %v768_v35 = vadd.f32 1.0, %v1500_v3 }
 0x134   : > { %1000 = vmatprep.mubr.bf16.mxu1 %v818_v12  ;;  %v804_v21 = vmul.f32 %v784_v19, %v1941_v47  ;;  %v785_v9 = vmul.f32 0.5, %v765_v10  ;;  %v770_v36 = vadd.f32 1.0, %v1504_v22  ;;  %v767_v54 = vadd.f32 1.0, %v1498_v61  ;;  %v1321_v12 = vld [vmem:[%s2221_s6] ss:$0 sm:$0xff] }
 0x135   : > { %v817_v32 = vpack.c.bf16 %v801_v14, %v799_v13  ;;  %v806_v1 = vmul.f32 %v786_v27, %v1953_v62  ;;  %v803_v23 = vmul.f32 %v783_v28, %v1937_v38  ;;  %v788_v7 = vmul.f32 0.5, %v768_v35 }
 0x136   : > { %v805_v15 = vmul.f32 %v785_v9, %v1947_v57  ;;  %v790_v39 = vmul.f32 0.5, %v770_v36  ;;  %v769_v45 = vadd.f32 1.0, %v1502_v11  ;;  %v787_v18 = vmul.f32 0.5, %v767_v54 }
 0x137   : > { %v820_v20 = vpack.c.bf16 %v806_v1, %v804_v21  ;;  %v808_v47 = vmul.f32 %v788_v7, %v1971_v29 }
 0x138   : > { %v1506_v49 = vpop.eup %1505  ;;  %1001 = vmatmul.mubr.bf16.gmra.mrb[4].mxu1 %v817_v32  ;;  %v819_v50 = vpack.c.bf16 %v805_v15, %v803_v23  ;;  %v810_v53 = vmul.f32 %v790_v39, %v1985_v52  ;;  %v789_v26 = vmul.f32 0.5, %v769_v45  ;;  %v807_v59 = vmul.f32 %v787_v18, %v1967_v24 }
 0x139   : > { %v1508_v31 = vpop.eup %1507  ;;  %1008 = vmatprep.mubr.bf16.mxu1 %v820_v20  ;;  %v771_v62 = vadd.f32 1.0, %v1506_v49 }
 0x13a   : > { %v1510_v48 = vpop.eup %1509  ;;  %v822_v38 = vpack.c.bf16 %v810_v53, %v808_v47  ;;  %v809_v57 = vmul.f32 %v789_v26, %v1979_v37  ;;  %v772_v60 = vadd.f32 1.0, %v1508_v31 }
 0x13b   : > { %v1512_v46 = vpop.eup %1511  ;;  %v773_v8 = vadd.f32 1.0, %v1510_v48  ;;  %v791_v41 = vmul.f32 0.5, %v771_v62 }
 0x13c   : > { %v821_v61 = vpack.c.bf16 %v809_v57, %v807_v59  ;;  %v774_v51 = vadd.f32 1.0, %v1512_v46  ;;  %v792_v25 = vmul.f32 0.5, %v772_v60 }
 0x13d   : > { %v793_v29 = vmul.f32 0.5, %v773_v8  ;;  %v811_v52 = vmul.f32 %v791_v41, %v2001_v2 }
 0x13e   : > { %v794_v63 = vmul.f32 0.5, %v774_v51  ;;  %v812_v0 = vmul.f32 %v792_v25, %v2005_v30 }
 0x13f   : > { %v813_v3 = vmul.f32 %v793_v29, %v2012_v40 }
 0x140   : > { %1009 = vmatmul.mubr.bf16.gmra.mrb[8].mxu1 %v819_v50  ;;  %v814_v24 = vmul.f32 %v794_v63, %v2018_v58 }
 0x141   : > { %1016 = vmatprep.mubr.bf16.mxu1 %v822_v38  ;;  %v823_v37 = vpack.c.bf16 %v813_v3, %v811_v52 }
 0x142   : > { %v824_v44 = vpack.c.bf16 %v814_v24, %v812_v0 }
 0x148   : > { %1017 = vmatmul.mubr.bf16.gmra.mrb[12].mxu1 %v821_v61 }
 0x149   : > { %1024 = vmatprep.mubr.bf16.mxu1 %v824_v44 }
 0x150   : > { %1025 = vmatmul.mubr.bf16.gmra.mrb[16].mxu1 %v823_v37 }
 0x203   : > { %v1360_v4 = vpop.f32.mrb[0].mxu1 }
 0x204   : > { %v1361_v11 = vpop.f32.mrb[1].mxu1 }
 0x205   : > { %v1362_v2 = vadd.f32 %v1361_v11, %v1360_v4  ;;  %v1363_v13 = vpop.f32.mrb[2].mxu1 }
 0x206   : > { %v1364_v40 = vpop.f32.mrb[3].mxu1 }
 0x207   : > { %v1365_v19 = vadd.f32 %v1364_v40, %v1363_v13  ;;  %v995_v10 = vadd.f32 %v1362_v2, %v1321_v12 }
 0x209   : > { %1033 = vadd.xlane.f32.xlu0 %v995_v10  ;;  %v998_v58 = vadd.f32 %v1365_v19, %v1321_v12 }
 0x20b   : > { %v1366_v30 = vpop.f32.mrb[4].mxu1 }
 0x20c   : > { %v1367_v22 = vpop.f32.mrb[5].mxu1 }
 0x20d   : > { %v1368_v14 = vadd.f32 %v1367_v22, %v1366_v30  ;;  %v1369_v27 = vpop.f32.mrb[6].mxu1  ;;  %1035 = vadd.xlane.f32.xlu0 %v998_v58 }
 0x20e   : > { %v1370_v28 = vpop.f32.mrb[7].mxu1 }
 0x20f   : > { %v1371_v35 = vadd.f32 %v1370_v28, %v1369_v27  ;;  %v1003_v21 = vadd.f32 %v1368_v14, %v1321_v12 }
 0x211   : > { %1037 = vadd.xlane.f32.xlu1 %v1003_v21  ;;  %v1006_v36 = vadd.f32 %v1371_v35, %v1321_v12 }
 0x213   : > { %v1372_v9 = vpop.f32.mrb[8].mxu1 }
 0x214   : > { %v1373_v54 = vpop.f32.mrb[9].mxu1 }
 0x215   : > { %v1374_v32 = vadd.f32 %v1373_v54, %v1372_v9  ;;  %v1375_v1 = vpop.f32.mrb[10].mxu1  ;;  %1039 = vadd.xlane.f32.xlu1 %v1006_v36 }
 0x216   : > { %v1376_v23 = vpop.f32.mrb[11].mxu1 }
 0x217   : > { %v1377_v7 = vadd.f32 %v1376_v23, %v1375_v1  ;;  %v1011_v15 = vadd.f32 %v1374_v32, %v1321_v12 }
 0x219   : > { %1041 = vadd.xlane.f32.xlu0 %v1011_v15  ;;  %v1014_v39 = vadd.f32 %v1377_v7, %v1321_v12 }
 0x21b   : > { %v1378_v45 = vpop.f32.mrb[12].mxu1  ;;  %1043 = vadd.xlane.f32.xlu1 %v1014_v39 }
 0x21c   : > { %v1379_v18 = vpop.f32.mrb[13].mxu1 }
 0x21d   : > { %v1380_v20 = vadd.f32 %v1379_v18, %v1378_v45  ;;  %v1381_v49 = vpop.f32.mrb[14].mxu1 }
 0x21e   : > { %v1382_v50 = vpop.f32.mrb[15].mxu1 }
 0x21f   : > { %v1383_v47 = vadd.f32 %v1382_v50, %v1381_v49  ;;  %v1019_v53 = vadd.f32 %v1380_v20, %v1321_v12 }
 0x221   : > { %1045 = vadd.xlane.f32.xlu0 %v1019_v53  ;;  %v1022_v26 = vadd.f32 %v1383_v47, %v1321_v12 }
 0x223   : > { %v1384_v31 = vpop.f32.mrb[16].mxu1  ;;  %1047 = vadd.xlane.f32.xlu1 %v1022_v26 }
 0x224   : > { %v1385_v62 = vpop.f32.mrb[17].mxu1 }
 0x225   : > { %v1386_v48 = vadd.f32 %v1385_v62, %v1384_v31  ;;  %v1387_v38 = vpop.f32.mrb[18].mxu1 }
 0x226   : > { %v1388_v59 = vpop.f32.mrb[19].mxu1 }
 0x227   : > { %v1389_v57 = vadd.f32 %v1388_v59, %v1387_v38  ;;  %v1027_v60 = vadd.f32 %v1386_v48, %v1321_v12 }
 0x229   : > { %1049 = vadd.xlane.f32.xlu0 %v1027_v60  ;;  %v1030_v46 = vadd.f32 %v1389_v57, %v1321_v12 }
 0x22b   : > { %1051 = vadd.xlane.f32.xlu1 %v1030_v46 }
 0x296   : > { %v1034_v8 = vpop.xlane.xlu0 %1033 }
 0x297   : > { %v1054_v41 = vmul.f32 0.0078125, %v1034_v8 }
 0x299   : > { %v2058_v61 = vsub.f32 %v995_v10, %v1054_v41 }
 0x29a   : > { %v1036_v51 = vpop.xlane.xlu0 %1035 }
 0x29b   : > { %v1055_v25 = vmul.f32 0.0078125, %v1036_v51  ;;  %v1074_v29 = vmul.f32 %v2058_v61, %v2058_v61  ;;  %v2108_v51 = vld [vmem:[%s2223_s8] ss:$0 sm:$0xff] }
 0x29d   : > { %v2062_v63 = vsub.f32 %v998_v58, %v1055_v25  ;;  %1084 = vadd.xlane.f32.xlu0 %v1074_v29 }
 0x29e   : > { %v1038_v52 = vpop.xlane.xlu1 %1037 }
 0x29f   : > { %v1056_v3 = vmul.f32 0.0078125, %v1038_v52  ;;  %v1075_v0 = vmul.f32 %v2062_v63, %v2062_v63 }
 0x2a1   : > { %v2066_v24 = vsub.f32 %v1003_v21, %v1056_v3  ;;  %1086 = vadd.xlane.f32.xlu1 %v1075_v0 }
 0x2a2   : > { %v1040_v37 = vpop.xlane.xlu1 %1039 }
 0x2a3   : > { %v1057_v44 = vmul.f32 0.0078125, %v1040_v37  ;;  %v1076_v4 = vmul.f32 %v2066_v24, %v2066_v24 }
 0x2a5   : > { %v2070_v11 = vsub.f32 %v1006_v36, %v1057_v44  ;;  %1088 = vadd.xlane.f32.xlu0 %v1076_v4 }
 0x2a6   : > { %v1042_v12 = vpop.xlane.xlu0 %1041 }
 0x2a7   : > { %v1058_v2 = vmul.f32 0.0078125, %v1042_v12  ;;  %v1077_v13 = vmul.f32 %v2070_v11, %v2070_v11 }
 0x2a8   : > { %v1044_v40 = vpop.xlane.xlu1 %1043 }
 0x2a9   : > { %v2074_v19 = vsub.f32 %v1011_v15, %v1058_v2  ;;  %v1059_v10 = vmul.f32 0.0078125, %v1044_v40  ;;  %1090 = vadd.xlane.f32.xlu1 %v1077_v13 }
 0x2ab   : > { %v2076_v30 = vsub.f32 %v1014_v39, %v1059_v10  ;;  %v1078_v58 = vmul.f32 %v2074_v19, %v2074_v19 }
 0x2ad   : > { %1092 = vadd.xlane.f32.xlu0 %v1078_v58  ;;  %v1079_v22 = vmul.f32 %v2076_v30, %v2076_v30 }
 0x2ae   : > { %v1046_v14 = vpop.xlane.xlu0 %1045 }
 0x2af   : > { %v1060_v27 = vmul.f32 0.0078125, %v1046_v14  ;;  %1094 = vadd.xlane.f32.xlu1 %v1079_v22 }
 0x2b0   : > { %v1048_v28 = vpop.xlane.xlu1 %1047 }
 0x2b1   : > { %v2082_v35 = vsub.f32 %v1019_v53, %v1060_v27  ;;  %v1061_v21 = vmul.f32 0.0078125, %v1048_v28 }
 0x2b3   : > { %v2084_v9 = vsub.f32 %v1022_v26, %v1061_v21  ;;  %v1080_v36 = vmul.f32 %v2082_v35, %v2082_v35 }
 0x2b5   : > { %1096 = vadd.xlane.f32.xlu0 %v1080_v36  ;;  %v1081_v54 = vmul.f32 %v2084_v9, %v2084_v9 }
 0x2b6   : > { %v1050_v32 = vpop.xlane.xlu0 %1049 }
 0x2b7   : > { %v1062_v1 = vmul.f32 0.0078125, %v1050_v32  ;;  %1098 = vadd.xlane.f32.xlu1 %v1081_v54 }
 0x2b8   : > { %v1052_v23 = vpop.xlane.xlu1 %1051 }
 0x2b9   : > { %v2090_v7 = vsub.f32 %v1027_v60, %v1062_v1  ;;  %v1063_v15 = vmul.f32 0.0078125, %v1052_v23  ;;  %v2102_v60 = vld [vmem:[%s2222_s7] ss:$0 sm:$0xff] }
 0x2bb   : > { %v2092_v39 = vsub.f32 %v1030_v46, %v1063_v15  ;;  %v1082_v45 = vmul.f32 %v2090_v7, %v2090_v7 }
 0x2bd   : > { %1100 = vadd.xlane.f32.xlu0 %v1082_v45  ;;  %v1083_v18 = vmul.f32 %v2092_v39, %v2092_v39 }
 0x2bf   : > { %1102 = vadd.xlane.f32.xlu1 %v1083_v18 }
 0x32a   : > { %v1085_v20 = vpop.xlane.xlu0 %1084 }
 0x32b   : > { %v1104_v49 = vmul.f32 0.0078125, %v1085_v20 }
 0x32d   : > { %v1114_v50 = vadd.f32 1e-05, %v1104_v49 }
 0x32e   : > { %v1087_v47 = vpop.xlane.xlu1 %1086 }
 0x32f   : > { %1513 = vrsqrt.f32 %v1114_v50  ;;  %v1105_v53 = vmul.f32 0.0078125, %v1087_v47 }
 0x331   : > { %v1115_v26 = vadd.f32 1e-05, %v1105_v53 }
 0x332   : > { %v1089_v31 = vpop.xlane.xlu0 %1088 }
 0x333   : > { %1515 = vrsqrt.f32 %v1115_v26  ;;  %v1106_v62 = vmul.f32 0.0078125, %v1089_v31 }
 0x335   : > { %v1116_v48 = vadd.f32 1e-05, %v1106_v62 }
 0x336   : > { %v1091_v38 = vpop.xlane.xlu1 %1090 }
 0x337   : > { %1517 = vrsqrt.f32 %v1116_v48  ;;  %v1107_v59 = vmul.f32 0.0078125, %v1091_v38 }
 0x339   : > { %v1514_v57 = vpop.eup %1513  ;;  %v1117_v46 = vadd.f32 1e-05, %v1107_v59 }
 0x33a   : > { %v1134_v8 = vmul.f32 %v1514_v57, %v2058_v61  ;;  %v1093_v41 = vpop.xlane.xlu0 %1092 }
 0x33b   : > { %1519 = vrsqrt.f32 %v1117_v46  ;;  %v1108_v25 = vmul.f32 0.0078125, %v1093_v41 }
 0x33c   : > { %v1151_v29 = vmul.f32 %v2102_v60, %v1134_v8  ;;  %v1095_v52 = vpop.xlane.xlu1 %1094 }
 0x33d   : > { %v1516_v3 = vpop.eup %1515  ;;  %v1118_v0 = vadd.f32 1e-05, %v1108_v25  ;;  %v1109_v37 = vmul.f32 0.0078125, %v1095_v52 }
 0x33e   : > { %v1168_v44 = vadd.f32 %v2108_v51, %v1151_v29  ;;  %v1135_v61 = vmul.f32 %v1516_v3, %v2062_v63 }
 0x33f   : > { %1521 = vrsqrt.f32 %v1118_v0  ;;  %v1119_v4 = vadd.f32 1e-05, %v1109_v37 }
 0x340   : > { %v1178_v12 = vadd.f32 %v1168_v44, %v1774_v33  ;;  %v1152_v2 = vmul.f32 %v2102_v60, %v1135_v61 }
 0x341   : > { %v1518_v13 = vpop.eup %1517  ;;  %1523 = vrsqrt.f32 %v1119_v4 }
 0x342   : > { %1188 = vst [vmem:[%s2117_s25] sm:$0xff] %v1178_v12  ;;  %v1169_v40 = vadd.f32 %v2108_v51, %v1152_v2  ;;  %v1136_v10 = vmul.f32 %v1518_v13, %v2066_v24  ;;  %v1097_v58 = vpop.xlane.xlu0 %1096 }
 0x343   : > { %v1110_v22 = vmul.f32 0.0078125, %v1097_v58 }
 0x344   : > { %v1179_v63 = vadd.f32 %v1169_v40, %v1776_v34  ;;  %v1153_v33 = vmul.f32 %v2102_v60, %v1136_v10  ;;  %v1099_v14 = vpop.xlane.xlu1 %1098 }
 0x345   : > { %v1520_v27 = vpop.eup %1519  ;;  %v1120_v28 = vadd.f32 1e-05, %v1110_v22  ;;  %v1111_v21 = vmul.f32 0.0078125, %v1099_v14 }
 0x346   : > { %1189 = vst [vmem:[%s2117_s25 + $0x8] sm:$0xff] %v1179_v63  ;;  %v1170_v36 = vadd.f32 %v2108_v51, %v1153_v33  ;;  %v1137_v54 = vmul.f32 %v1520_v27, %v2070_v11 }
 0x347   : > { %1525 = vrsqrt.f32 %v1120_v28  ;;  %v1121_v32 = vadd.f32 1e-05, %v1111_v21 }
 0x348   : > { %v1180_v24 = vadd.f32 %v1170_v36, %v1784_v42  ;;  %v1154_v1 = vmul.f32 %v2102_v60, %v1137_v54 }
 0x349   : > { %v1522_v23 = vpop.eup %1521  ;;  %1527 = vrsqrt.f32 %v1121_v32 }
 0x34a   : > { %1190 = vst [vmem:[%s2117_s25 + $0x10] sm:$0xff] %v1180_v24  ;;  %v1171_v34 = vadd.f32 %v2108_v51, %v1154_v1  ;;  %v1138_v15 = vmul.f32 %v1522_v23, %v2074_v19  ;;  %v1101_v45 = vpop.xlane.xlu0 %1100 }
 0x34b   : > { %v1524_v18 = vpop.eup %1523  ;;  %v1112_v20 = vmul.f32 0.0078125, %v1101_v45 }
 0x34c   : > { %v1181_v11 = vadd.f32 %v1171_v34, %v1786_v43  ;;  %v1155_v49 = vmul.f32 %v2102_v60, %v1138_v15  ;;  %v1139_v42 = vmul.f32 %v1524_v18, %v2076_v30  ;;  %v1103_v50 = vpop.xlane.xlu1 %1102 }
 0x34d   : > { %v1122_v47 = vadd.f32 1e-05, %v1112_v20  ;;  %v1113_v53 = vmul.f32 0.0078125, %v1103_v50 }
 0x34e   : > { %1191 = vst [vmem:[%s2117_s25 + $0x18] sm:$0xff] %v1181_v11  ;;  %v1172_v26 = vadd.f32 %v2108_v51, %v1155_v49  ;;  %v1156_v31 = vmul.f32 %v2102_v60, %v1139_v42 }
 0x34f   : > { %1529 = vrsqrt.f32 %v1122_v47  ;;  %v1123_v19 = vadd.f32 1e-05, %v1113_v53 }
 0x350   : > { %v1182_v62 = vadd.f32 %v1172_v26, %v1797_v55  ;;  %v1173_v43 = vadd.f32 %v2108_v51, %v1156_v31 }
 0x351   : > { %v1526_v48 = vpop.eup %1525  ;;  %1531 = vrsqrt.f32 %v1123_v19 }
 0x352   : > { %1192 = vst [vmem:[%s2117_s25 + $0x20] sm:$0xff] %v1182_v62  ;;  %v1183_v30 = vadd.f32 %v1173_v43, %v1799_v56  ;;  %v1140_v38 = vmul.f32 %v1526_v48, %v2082_v35 }
 0x353   : > { %v1528_v59 = vpop.eup %1527 }
 0x354   : > { %1193 = vst [vmem:[%s2117_s25 + $0x28] sm:$0xff] %v1183_v30  ;;  %v1157_v57 = vmul.f32 %v2102_v60, %v1140_v38  ;;  %v1141_v46 = vmul.f32 %v1528_v59, %v2084_v9 }
 0x356   : > { %v1174_v55 = vadd.f32 %v2108_v51, %v1157_v57  ;;  %v1158_v8 = vmul.f32 %v2102_v60, %v1141_v46 }
 0x358   : > { %v1184_v41 = vadd.f32 %v1174_v55, %v1810_v5  ;;  %v1175_v25 = vadd.f32 %v2108_v51, %v1158_v8 }
 0x359   : > { %v1530_v56 = vpop.eup %1529 }
 0x35a   : > { %1194 = vst [vmem:[%s2117_s25 + $0x30] sm:$0xff] %v1184_v41  ;;  %v1185_v35 = vadd.f32 %v1175_v25, %v1812_v6  ;;  %v1142_v29 = vmul.f32 %v1530_v56, %v2090_v7 }
 0x35b   : > { %v1532_v52 = vpop.eup %1531 }
 0x35c   : > { %1195 = vst [vmem:[%s2117_s25 + $0x38] sm:$0xff] %v1185_v35  ;;  %v1159_v9 = vmul.f32 %v2102_v60, %v1142_v29  ;;  %v1143_v3 = vmul.f32 %v1532_v52, %v2092_v39 }
 0x35e   : > { %v1176_v5 = vadd.f32 %v2108_v51, %v1159_v9  ;;  %v1160_v0 = vmul.f32 %v2102_v60, %v1143_v3 }
 0x360   : > { %v1186_v37 = vadd.f32 %v1176_v5, %v1821_v16  ;;  %v1177_v6 = vadd.f32 %v2108_v51, %v1160_v0 }
 0x362   : > { %1196 = vst [vmem:[%s2117_s25 + $0x40] sm:$0xff] %v1186_v37  ;;  %v1187_v7 = vadd.f32 %v1177_v6, %v1823_v17 }
 0x364   : > { %1197 = vst [vmem:[%s2117_s25 + $0x48] sm:$0xff] %v1187_v7 }
 0x365   : > { %1546 = shalt.err (!%p1543_p3)
}
 0x366   : > { %s1547_s17 = scalar_lea.hbm %s2169_s23, 1280  ;;  %s1551_s26 = scalar_lea.hbm %s2224_s9, 2560 }
 0x367   : > { %p1548_p4 = scmp.ne.s32.totalorder %s2169_s23, %s1547_s17  ;;  %p1552_p9 = scmp.lt.u32.totalorder %s2169_s23, %s2224_s9 }
 0x368   : > { %p1553_p10 = scmp.lt.u32.totalorder %s1551_s26, %s1547_s17  ;;  %p1555_p12 = scmp.lt.u32.totalorder %s1547_s17, %s2169_s23 }
 0x369   : > { %p1549_p7 = pnand %p1548_p4, %p1689_p5 }
 0x36a   : > { %p1554_p11 = por %p1553_p10, %p1552_p9 }
 0x36b   : > { %p1550_p8 = pneg %p1549_p7 }
 0x36c   : > { %p1556_p13 = por %p1555_p12, %p1554_p11 }
 0x36e   : > { %p1557_p0 = pnand %p1556_p13, %p1550_p8 }
 0x370   : > { %1560 = shalt.err (!%p1557_p0)
}
 0x371   : > { %s1599_s28 = smov 128   ;;  %s1600_s21 = smov 8  }
 0x372   : > { %1391 = dma.vmem_to_hbm [thread:$0]  (%p1689_p5), %s2162_s27, 1280, %s2169_s23, %s2174_s13, %s1599_s28, %s1599_s28, %s1600_s21  }
 0x373 PF: > { %p1397_p1 = scmp.ge.s32.totalorder %s1595_s12, 2  ;;  %s1227_s22 = sand.u32 1, %s1583_s30  }
 0x374   : > { %s1228_s16 = scalar_lea.sflag [#allocation3], %s1227_s22 }
 0x375   : > { %p1394_p2 = pnand %p1397_p1, %p1693_p6 }
 0x377   : > { %1578 = dma.done.wait (!%p1394_p2), %s1228_s16, 1280  }
 0x378   : > { %1580 = vsyncadd (!%p1394_p2), %s1228_s16, 4294966016  ;;  %p19_p3 = scmp.ge.s32.totalorder %s1676_s15, 4   ;;  %s2227_s30 = smov %s1587_s10 }
 0x379   : > { %s2228_s10 = smov %s1591_s11  ;;  %s2229_s11 = smov %s1687_s18 }
 0x37a   : > { %s2230_s12 = smov %s1676_s15  ;;  %21 = sbr.rel (!%p19_p3) target bundleno = 3 (0x3), region = 97 }
 0x381   :  { %1233 = vsyncpa [#allocation3], 1 }
 0x382   :  { %1235 = vsyncpa [#allocation3 + $0x1], 1 }

</bundles_post_ra>
